<compile_context>
chip_gen: v7x
topology: tpu7x:2x2x1
jax: 0.10.0
libtpu: 0.0.40
codegen_flags: <defaults>
</compile_context>

<pallas_src>
import jax
import jax.numpy as jnp
from jax.experimental import pallas as pl
from jax.experimental.pallas import tpu as pltpu

_LANES = 128
_CLAMP_LO = -0.5 + 1.0 / 512.0
_CLAMP_HI = 0.5 - 1.0 / 512.0


def _round_up(n, m):
    return (n + m - 1) // m * m


# ----------------------------------------------------------------------------
# Fused conv-as-matmul Pallas kernel:  out = epi(scale * (elu?(x) @ W + b))
# ----------------------------------------------------------------------------
def _make_mm_kernel(input_elu, scale, clamp):
    def kernel(x_ref, w_ref, b_ref, o_ref):
        x = x_ref[...]
        if input_elu:
            dt = x.dtype
            xf = x.astype(jnp.float32)
            xf = jnp.where(xf > 0.0, xf, jnp.exp(jnp.minimum(xf, 0.0)) - 1.0)
            x = xf.astype(dt)
        acc = jnp.dot(x, w_ref[...], preferred_element_type=jnp.float32)
        acc = acc + b_ref[...]
        if scale != 1.0:
            acc = acc * scale
        if clamp:
            acc = jnp.clip(acc, _CLAMP_LO, _CLAMP_HI)
        o_ref[...] = acc

    return kernel


def _pick_tm(M):
    # Prefer >=2 grid steps when M is big enough (keeps both v7x TCs busy),
    # otherwise a single whole-M block (amortizes per-step overhead on v5e/v6e).
    for tm in (512, 256, 128):
        if M % tm == 0 and M // tm >= 2:
            return tm
    for tm in (512, 256, 128):
        if M % tm == 0:
            return tm
    return M


def conv_matmul(patches, w2, b2, *, input_elu, scale=1.0, clamp=False):
    """(M, K) bf16 @ (K, Np) bf16 + (1, Np) f32, fused prologue/epilogue."""
    M, K = patches.shape
    Np = w2.shape[1]
    TM = _pick_tm(M)
    kernel = _make_mm_kernel(input_elu, scale, clamp)
    return pl.pallas_call(
        kernel,
        out_shape=jax.ShapeDtypeStruct((M, Np), jnp.float32),
        grid=(M // TM,),
        in_specs=[
            pl.BlockSpec((TM, K), lambda i: (i, 0)),
            pl.BlockSpec((K, Np), lambda i: (0, 0)),
            pl.BlockSpec((1, Np), lambda i: (0, 0)),
        ],
        out_specs=pl.BlockSpec((TM, Np), lambda i: (i, 0)),
        compiler_params=pltpu.CompilerParams(dimension_semantics=("parallel",)),
    )(patches, w2, b2)


# ----------------------------------------------------------------------------
# NHWC convs built on the fused matmul
# ----------------------------------------------------------------------------
def _im2col_nhwc(x, kh, kw, stride, pad):
    B, H, W, C = x.shape
    if pad:
        x = jnp.pad(x, ((0, 0), (pad, pad), (pad, pad), (0, 0)))
    Ho = (H + 2 * pad - kh) // stride + 1
    Wo = (W + 2 * pad - kw) // stride + 1
    taps = [
        x[:, ki:ki + stride * Ho:stride, kj:kj + stride * Wo:stride, :]
        for ki in range(kh) for kj in range(kw)
    ]
    # TODO(synk): move the kh*kw tap reduction into the Pallas grid (shifted-window
    # index_map + VMEM accumulator) to avoid materializing kh*kw x the input in HBM.
    patches = jnp.concatenate(taps, axis=-1).reshape(B * Ho * Wo, kh * kw * C)
    return patches, (B, Ho, Wo)


def conv2d(x, cp, *, stride, pad, input_elu, scale=1.0, clamp=False):
    """NHWC conv; cp holds pre-packed (K, Np) bf16 weights and (1, Np) bias."""
    assert x.shape[-1] == cp["cin"], (x.shape, cp["cin"])
    patches, (B, Ho, Wo) = _im2col_nhwc(
        x.astype(jnp.bfloat16), cp["kh"], cp["kw"], stride, pad)
    out = conv_matmul(patches, cp["w2"], cp["b2"],
                      input_elu=input_elu, scale=scale, clamp=clamp)
    return out.reshape(B, Ho, Wo, -1)[..., :cp["cout"]]


def conv_transpose2d(x, cp, *, stride, pad, input_elu, scale=1.0, clamp=False):
    # TODO(synk): replace zero-dilation lowering with sub-pixel decomposition so
    # the MXU does not multiply the inserted zeros.
    B, H, W, C = x.shape
    xd = jnp.zeros((B, (H - 1) * stride + 1, (W - 1) * stride + 1, C), x.dtype)
    xd = xd.at[:, ::stride, ::stride, :].set(x)
    # elu(0)=0, so the fused input-ELU commutes with zero dilation / zero padding.
    return conv2d(xd, cp, stride=1, pad=cp["kh"] - 1 - pad,
                  input_elu=input_elu, scale=scale, clamp=clamp)


# ----------------------------------------------------------------------------
# Reparameterized sample + KL Pallas kernel (lane-dense slabs)
# ----------------------------------------------------------------------------
def _kl_kernel(pm_ref, pls_ref, qm_ref, qls_ref, eps_ref, z_ref, kl_ref):
    pm, pls = pm_ref[...], pls_ref[...]
    qm, qls = qm_ref[...], qls_ref[...]
    eps = eps_ref[...]
    z = qm + jnp.exp(qls) * eps                 # posterior scale = exp(qls)
    dz = (z - pm) * jnp.exp(-2.0 * pls)         # prior scale     = exp(2*pls)
    # kl = log q(z|x) - log p(z); 0.5*log(2*pi) cancels, no log() needed
    kl_ref[...] = 0.5 * (dz * dz - eps * eps) + 2.0 * pls - qls
    z_ref[...] = z


def sample_and_kl(pz_mean, pz_logsd, post_mean, post_logsd, eps):
    shape = pz_mean.shape
    n = pz_mean.size
    n_pad = _round_up(n, _LANES * 8)
    rows = n_pad // _LANES

    def prep(a):
        a = a.reshape(-1)
        if n_pad != n:
            a = jnp.pad(a, (0, n_pad - n))
        return a.reshape(rows, _LANES)

    flats = [prep(a) for a in (pz_mean, pz_logsd, post_mean, post_logsd, eps)]

    blk = rows
    for cand in (1024, 512, 256):               # tile rows if the tensor grows (v7x VMEM)
        if rows > cand and rows % cand == 0:
            blk = cand
            break
    spec = pl.BlockSpec((blk, _LANES), lambda i: (i, 0))
    z, kl = pl.pallas_call(
        _kl_kernel,
        out_shape=(jax.ShapeDtypeStruct((rows, _LANES), jnp.float32),) * 2,
        grid=(rows // blk,),
        in_specs=[spec] * 5,
        out_specs=(spec, spec),
        compiler_params=pltpu.CompilerParams(dimension_semantics=("parallel",)),
    )(*flats)

    def post(a):
        a = a.reshape(-1)
        if n_pad != n:
            a = a[:n]
        return a.reshape(shape)

    return post(z), post(kl)


# ----------------------------------------------------------------------------
# IAF-VAE layers (non-IAF path)
# ----------------------------------------------------------------------------
def iaf_up(p, x, args, downsample):
    zc, hc = args.z_size, args.h_size
    out = conv2d(x, p["up_a"], stride=2 if downsample else 1, pad=1, input_elu=True)
    qz_mean = out[..., :zc]
    qz_logsd = out[..., zc:2 * zc]
    up_context = out[..., 2 * zc:2 * zc + hc]       # only used by the IAF flow
    h = out[..., 2 * zc + hc:2 * zc + 2 * hc]
    h = conv2d(h, p["up_b"], stride=1, pad=1, input_elu=True, scale=0.1)
    if downsample:
        x = x[:, ::2, ::2, :]                       # nearest, scale_factor=0.5
    return x + h, (qz_mean, qz_logsd, up_context)


def iaf_down(p, h_in, state, eps, args, downsample):
    zc, hc = args.z_size, args.h_size
    qz_mean, qz_logsd, _up_context = state
    x = conv2d(h_in, p["down_a"], stride=1, pad=1, input_elu=True)
    pz_mean = x[..., :zc]
    pz_logsd = x[..., zc:2 * zc]
    rz_mean = x[..., 2 * zc:3 * zc]
    rz_logsd = x[..., 3 * zc:4 * zc]
    # x[..., 4*zc:4*zc+hc] is down_context -- only used when args.iaf=True
    h_det = x[..., 4 * zc + hc:4 * zc + 2 * hc]

    post_mean = rz_mean + qz_mean
    post_logsd = rz_logsd + qz_logsd
    # TODO(synk): args.iaf=True path (ARMultiConv2d autoregressive flow) not implemented.
    z, kl_map = sample_and_kl(pz_mean, pz_logsd, post_mean, post_logsd, eps)

    B = kl_map.shape[0]
    kl = kl_map.sum(axis=(1, 2, 3))                     # (B,)
    kl_obj = kl_map.sum(axis=(1, 2)).mean(axis=0)       # (zc,) free-bits per channel
    kl_obj = jnp.maximum(kl_obj, args.free_bits).sum()
    kl_obj = jnp.full((B,), kl_obj, jnp.float32)

    h = jnp.concatenate([z, h_det], axis=-1)
    if downsample:
        h_in = jnp.repeat(jnp.repeat(h_in, 2, axis=1), 2, axis=2)   # nearest x2
        h = conv_transpose2d(h, p["down_b"], stride=2, pad=1, input_elu=True, scale=0.1)
    else:
        h = conv2d(h, p["down_b"], stride=1, pad=1, input_elu=True, scale=0.1)
    return h_in + h, kl, kl_obj


# ----------------------------------------------------------------------------
# VAE forward (NCHW in / NCHW out, NHWC inside)
# ----------------------------------------------------------------------------
def vae_forward(params, x_nchw, args, eps_keys):
    x = jnp.transpose(x_nchw, (0, 2, 3, 1))
    x = conv2d(x, params["first"], stride=2, pad=1, input_elu=False)

    states = []
    for i in range(args.depth):
        for j in range(args.n_blocks):
            downsample = i > 0 and j == 0
            x, st = iaf_up(params["layers"][i][j], x, args, downsample)
            states.append((i, j, downsample, st))

    B = x.shape[0]
    h = jnp.broadcast_to(params["h"].reshape(1, 1, 1, -1), x.shape)
    kl = jnp.zeros((B,), jnp.float32)
    kl_obj = jnp.zeros((B,), jnp.float32)
    for idx, (i, j, downsample, st) in enumerate(reversed(states)):
        eps = jax.random.normal(
            eps_keys[idx], (B,) + h.shape[1:3] + (args.z_size,), jnp.float32)
        h, ckl, ckl_obj = iaf_down(params["layers"][i][j], h, st, eps, args, downsample)
        kl = kl + ckl
        kl_obj = kl_obj + ckl_obj

    # final ELU + ConvTranspose + clamp fused into a single Pallas matmul
    x = conv_transpose2d(h, params["last"], stride=2, pad=1, input_elu=True, clamp=True)
    return jnp.transpose(x, (0, 3, 1, 2)), kl, kl_obj


# ----------------------------------------------------------------------------
# Deterministic synthetic parameters (weights pre-packed for the Pallas matmul)
# ----------------------------------------------------------------------------
def _pack_conv_weight(w, b):
    """PyTorch Conv2d weight (Cout,Cin,kh,kw) -> (K, Np) bf16 + (1, Np) f32 bias."""
    cout, cin, kh, kw = w.shape
    npad = _round_up(cout, _LANES)
    w2 = jnp.transpose(w, (2, 3, 1, 0)).reshape(kh * kw * cin, cout)
    w2 = jnp.pad(w2, ((0, 0), (0, npad - cout))).astype(jnp.bfloat16)
    b2 = jnp.pad(b, (0, npad - cout)).reshape(1, npad).astype(jnp.float32)
    return {"w2": w2, "b2": b2, "kh": kh, "kw": kw, "cin": cin, "cout": cout}


def _rand_conv(key, cout, cin, kh, kw, scale=0.05):
    kw_, kb_ = jax.random.split(key)
    w = scale * jax.random.normal(kw_, (cout, cin, kh, kw), jnp.float32)
    b = scale * jax.random.normal(kb_, (cout,), jnp.float32)
    return _pack_conv_weight(w, b)


def _rand_deconv(key, cin, cout, kh, kw, scale=0.05):
    kw_, kb_ = jax.random.split(key)
    w = scale * jax.random.normal(kw_, (cin, cout, kh, kw), jnp.float32)  # torch layout
    b = scale * jax.random.normal(kb_, (cout,), jnp.float32)
    # equivalent direct conv on the zero-dilated input: flip spatially, swap channels
    w_conv = jnp.transpose(w[:, :, ::-1, ::-1], (1, 0, 2, 3))
    return _pack_conv_weight(w_conv, b)


def init_params(key, args):
    zc, hc = args.z_size, args.h_size
    ks = iter(jax.random.split(key, 2 + args.depth * args.n_blocks * 4))
    params = {
        "h": jnp.zeros((hc,), jnp.float32),
        "dec_log_stdv": jnp.zeros((1,), jnp.float32),   # present in module, unused in forward
        "first": _rand_conv(next(ks), hc, 3, 4, 4),
        "last": _rand_deconv(next(ks), hc, 3, 4, 4),
    }
    up_out = 2 * zc + 2 * hc        # qz_mean, qz_logsd, up_context, h
    down_out = 4 * zc + 2 * hc      # pz/rz stats, down_context, h_det
    layers = []
    for i in range(args.depth):
        layer = []
        for j in range(args.n_blocks):
            downsample = i > 0 and j == 0
            p = {}
            if downsample:
                p["up_a"] = _rand_conv(next(ks), up_out, hc, 4, 4)
            else:
                p["up_a"] = _rand_conv(next(ks), up_out, hc, 3, 3)
            p["up_b"] = _rand_conv(next(ks), hc, hc, 3, 3)
            p["down_a"] = _rand_conv(next(ks), down_out, hc, 3, 3)
            if downsample:
                p["down_b"] = _rand_deconv(next(ks), hc + zc, hc, 4, 4)
            else:
                p["down_b"] = _rand_conv(next(ks), hc, hc + zc, 3, 3)
            layer.append(p)
        layers.append(layer)
    params["layers"] = layers
    return params


# ----------------------------------------------------------------------------
if __name__ == "__main__":
    class Args:
        h_size = 32
        z_size = 8
        depth = 2
        n_blocks = 1
        free_bits = 0.1
        iaf = False

    args = Args()
    key = jax.random.PRNGKey(0)
    kp, kx, ke = jax.random.split(key, 3)

    params = init_params(kp, args)
    x = jax.random.normal(kx, (2, 3, 16, 16), jnp.float32)
    eps_keys = jax.random.split(ke, args.depth * args.n_blocks)

    out, kl, kl_obj = vae_forward(params, x, args, eps_keys)
    jax.block_until_ready((out, kl, kl_obj))

    assert out.shape == (2, 3, 16, 16), out.shape
    assert kl.shape == (2,) and kl_obj.shape == (2,), (kl.shape, kl_obj.shape)
    assert bool(jnp.all(jnp.isfinite(out))), "non-finite output"
    assert float(out.max()) <= _CLAMP_HI + 1e-6 and float(out.min()) >= _CLAMP_LO - 1e-6
    print("KERNEL_OK")
</pallas_src>

<mosaic_0001>
module attributes {stable_mosaic.version = 11 : i64} {
  func.func @kernel(%arg0: i32, %arg1: memref<128x48xbf16, #tpu.memory_space<vmem>>, %arg2: memref<48x128xbf16, #tpu.memory_space<vmem>>, %arg3: memref<1x128xf32, #tpu.memory_space<vmem>>, %arg4: memref<128x128xf32, #tpu.memory_space<vmem>>) attributes {dimension_semantics = [#tpu.dimension_semantics<parallel>], iteration_bounds = array<i64: 1>, scalar_prefetch = 0 : i64, scratch_operands = 0 : i64, tpu.core_type = #tpu.core_type<tc>, window_params = [{transform_indices = @transform_0, window_bounds = array<i64: 128, 48>}, {pipeline_mode = #tpu.pipeline_mode<synchronous>, transform_indices = @transform_1, window_bounds = array<i64: 48, 128>}, {pipeline_mode = #tpu.pipeline_mode<synchronous>, transform_indices = @transform_2, window_bounds = array<i64: 1, 128>}, {transform_indices = @transform_3, window_bounds = array<i64: 128, 128>}]} {
    %c0 = arith.constant 0 : index
    %c0_0 = arith.constant 0 : index
    %0 = vector.load %arg1[%c0, %c0_0] : memref<128x48xbf16, #tpu.memory_space<vmem>>, vector<128x48xbf16>
    %c0_1 = arith.constant 0 : index
    %c0_2 = arith.constant 0 : index
    %1 = vector.load %arg2[%c0_1, %c0_2] : memref<48x128xbf16, #tpu.memory_space<vmem>>, vector<48x128xbf16>
    %cst = arith.constant dense<0.000000e+00> : vector<128x128xf32>
    %2 = tpu.matmul %0, %1, %cst {dimension_numbers = #tpu.dot_dimension_numbers<[1], [0], [0], [1], [0, 0, 1, 1], [], []>} : vector<128x48xbf16>, vector<48x128xbf16>, vector<128x128xf32> -> vector<128x128xf32>
    %c0_3 = arith.constant 0 : index
    %c0_4 = arith.constant 0 : index
    %3 = vector.load %arg3[%c0_3, %c0_4] : memref<1x128xf32, #tpu.memory_space<vmem>>, vector<1x128xf32>
    %4 = vector.broadcast %3 : vector<1x128xf32> to vector<128x128xf32>
    %5 = arith.addf %2, %4 : vector<128x128xf32>
    %c0_5 = arith.constant 0 : index
    %c0_6 = arith.constant 0 : index
    %6 = vector.load %arg4[%c0_5, %c0_6] : memref<128x128xf32, #tpu.memory_space<vmem>>, vector<128x128xf32>
    tpu.vector_store %arg4[%c0_5, %c0_6], %5 {strides = array<i32>} : memref<128x128xf32, #tpu.memory_space<vmem>>, vector<128x128xf32>,
    return
  }
  func.func @transform_0(%arg0: i32) -> (i32, i32) {
    %c0_i32 = arith.constant 0 : i32
    %c0_i32_0 = arith.constant 0 : i32
    return %arg0, %c0_i32 : i32, i32
  }
  func.func @transform_1(%arg0: i32) -> (i32, i32) {
    %c0_i32 = arith.constant 0 : i32
    %c0_i32_0 = arith.constant 0 : i32
    %c0_i32_1 = arith.constant 0 : i32
    return %c0_i32, %c0_i32_0 : i32, i32
  }
  func.func @transform_2(%arg0: i32) -> (i32, i32) {
    %c0_i32 = arith.constant 0 : i32
    %c0_i32_0 = arith.constant 0 : i32
    %c0_i32_1 = arith.constant 0 : i32
    return %c0_i32, %c0_i32_0 : i32, i32
  }
  func.func @transform_3(%arg0: i32) -> (i32, i32) {
    %c0_i32 = arith.constant 0 : i32
    %c0_i32_0 = arith.constant 0 : i32
    return %arg0, %c0_i32 : i32, i32
  }
}

</mosaic_0001>

<bundles_post_ra>
// kernel: tpu_custom_call.1
= control target key start
LH: loop header
LB: loop body
LE: loop exit
PB: predicated region body
PF: predicated region fallthrough
CT: control target
= control target key end

     0   :  { %vm103_vm0 = vcmask 392192   ;;  %s433_s0 = inlined_call_operand.vmem [shape: bf16[128,48], index: 0, kind: input, shape index: {}]   ;;  %s434_s1 = inlined_call_operand.vmem [shape: bf16[48,128], index: 1, kind: input, shape index: {}]   ;;  %s435_s2 = inlined_call_operand.vmem [shape: f32[1,128], index: 2, kind: input, shape index: {}]   ;;  %s436_s3 = inlined_call_operand.hbm [shape: f32[128,128], index: 3, kind: output, shape index: {}]  }
   0x1   :  { %v319_v0 = vld [vmem:[%s434_s1] sm:$0xff]   ;;  %v320_v1 = vld [vmem:[%s434_s1 + $0x8] sm:$0xff]   ;;  %v321_v2 = vld [vmem:[%s434_s1 + $0x10] sm:$0xff]  }
   0x2   :  { %288 = vmatprep.subr.bf16.mxu0 %v319_v0  ;;  %310 = vmatprep.subr.bf16.mxu1 %v319_v0  ;;  %v322_v3 = vld [vmem:[%s433_s0] sm:$0xff]   ;;  %v324_v5 = vld [vmem:[%s433_s0 + $0x8] sm:$0xff]   ;;  %v326_v7 = vld [vmem:[%s433_s0 + $0x10] sm:$0xff]  }
   0x3   :  { %289 = vmatpush3.bf16.msra.mxu0 %v319_v0  ;;  %313 = vmatpush3.bf16.msra.mxu1 %v319_v0  ;;  %v323_v4 = vld [vmem:[%s433_s0 + $0x20] sm:$0xff]   ;;  %v325_v6 = vld [vmem:[%s433_s0 + $0x28] sm:$0xff]   ;;  %v327_v8 = vld [vmem:[%s433_s0 + $0x30] sm:$0xff]  }
   0x4   :  { %290 = vmatprep.subr.bf16.mxu0 %v320_v1  ;;  %311 = vmatprep.subr.bf16.mxu1 %v320_v1 }
   0x5   :  { %294 = vmatprep.mubr.msk.bf16.mxu0 %vm103_vm0, %v322_v3  ;;  %302 = vmatprep.mubr.msk.bf16.mxu1 %vm103_vm0, %v323_v4 }
   0x7   :  { %291 = vmatpush3.bf16.msra.mxu0 %v320_v1  ;;  %314 = vmatpush3.bf16.msra.mxu1 %v320_v1 }
   0x8   :  { %292 = vmatprep.subr.bf16.mxu0 %v321_v2  ;;  %312 = vmatprep.subr.bf16.mxu1 %v321_v2 }
   0xb   :  { %293 = vmatpush3.bf16.msra.mxu0 %v321_v2  ;;  %315 = vmatpush3.bf16.msra.mxu1 %v321_v2 }
   0xc   :  { %8 = vsyncpa [#allocation3], 0  ;;  %v328_v9 = vld [vmem:[%s433_s0 + $0x18] sm:$0xff]   ;;  %v257_v11 = vld [vmem:[%s435_s2] ss:$0 sm:$0xff] }
   0xd   :  { %v329_v10 = vld [vmem:[%s433_s0 + $0x38] sm:$0xff]   ;;  %s354_s0 = smov [#allocation2]  }
   0xe   :  { %295 = vmatmul.mubr.msk.bf16.vlgmr.msra.gmra.mrb[0].mxu0 %vm103_vm0, %v324_v5  ;;  %303 = vmatmul.mubr.msk.bf16.vlgmr.msra.gmra.mrb[0].mxu1 %vm103_vm0, %v325_v6  ;;  %s246_s2 = sshll.u32 %s354_s0, 4  ;;  %s247_s2 = int_to_ptr.vmem [resolvable:$true] %s246_s2 }
   0xf   :  { %298 = vmatprep.mubr.msk.bf16.mxu0 %vm103_vm0, %v326_v7  ;;  %306 = vmatprep.mubr.msk.bf16.mxu1 %vm103_vm0, %v327_v8  ;;  %s330_s8 = scalar_lea.vmem %s247_s2, 2048  ;;  %p335_p1 = scmp.lt.s32.totalorder %s247_s2, %s247_s2 }
  0x10   :  { %p331_p0 = scmp.ne.s32.totalorder %s247_s2, %s330_s8  ;;  %p336_p2 = scmp.lt.s32.totalorder %s330_s8, %s330_s8 }
  0x12   :  { %p337_p3 = por %p336_p2, %p335_p1 }
  0x14   :  { %p338_p4 = pnand %p337_p3, %p331_p0 }
  0x16   :  { %299 = vmatmul.mubr.msk.bf16.gmra.mrb[4].mxu0 %vm103_vm0, %v328_v9  ;;  %307 = vmatmul.mubr.msk.bf16.gmra.mrb[4].mxu1 %vm103_vm0, %v329_v10 }
  0xe1   :  { %v296_v12 = vpop.f32.mrb[0].mxu0  ;;  %v304_v13 = vpop.f32.mrb[0].mxu1 }
  0xe2   :  { %v171_v14 = vadd.f32 %v296_v12, %v257_v11  ;;  %v203_v15 = vadd.f32 %v304_v13, %v257_v11  ;;  %v162_v16 = vpop.f32.mrb[1].mxu0  ;;  %v194_v17 = vpop.f32.mrb[1].mxu1 }
  0xe3   :  { %v163_v18 = vadd.f32 %v257_v11, %v162_v16  ;;  %v195_v19 = vadd.f32 %v257_v11, %v194_v17  ;;  %v297_v20 = vpop.f32.mrb[2].mxu0  ;;  %v305_v21 = vpop.f32.mrb[2].mxu1 }
  0xe4   :  { %227 = vst [vmem:[#allocation2 + $0x10] sm:$0xff] %v171_v14  ;;  %235 = vst [vmem:[#allocation2 + $0x50] sm:$0xff] %v203_v15  ;;  %v174_v22 = vadd.f32 %v297_v20, %v257_v11  ;;  %v206_v23 = vadd.f32 %v305_v21, %v257_v11  ;;  %v165_v24 = vpop.f32.mrb[3].mxu0  ;;  %v197_v25 = vpop.f32.mrb[3].mxu1 }
  0xe5   :  { %225 = vst [vmem:[#allocation2] sm:$0xff] %v163_v18  ;;  %233 = vst [vmem:[#allocation2 + $0x40] sm:$0xff] %v195_v19  ;;  %v166_v26 = vadd.f32 %v257_v11, %v165_v24  ;;  %v198_v27 = vadd.f32 %v257_v11, %v197_v25 }
  0xe6   :  { %228 = vst [vmem:[#allocation2 + $0x18] sm:$0xff] %v174_v22  ;;  %236 = vst [vmem:[#allocation2 + $0x58] sm:$0xff] %v206_v23 }
  0xe7   :  { %226 = vst [vmem:[#allocation2 + $0x8] sm:$0xff] %v166_v26  ;;  %234 = vst [vmem:[#allocation2 + $0x48] sm:$0xff] %v198_v27 }
  0xe9   :  { %v300_v28 = vpop.f32.mrb[4].mxu0  ;;  %v308_v29 = vpop.f32.mrb[4].mxu1 }
  0xea   :  { %v187_v30 = vadd.f32 %v300_v28, %v257_v11  ;;  %v219_v31 = vadd.f32 %v308_v29, %v257_v11  ;;  %v178_v32 = vpop.f32.mrb[5].mxu0  ;;  %v210_v33 = vpop.f32.mrb[5].mxu1 }
  0xeb   :  { %v179_v34 = vadd.f32 %v257_v11, %v178_v32  ;;  %v211_v35 = vadd.f32 %v257_v11, %v210_v33  ;;  %v301_v36 = vpop.f32.mrb[6].mxu0  ;;  %v309_v37 = vpop.f32.mrb[6].mxu1 }
  0xec   :  { %231 = vst [vmem:[#allocation2 + $0x30] sm:$0xff] %v187_v30  ;;  %239 = vst [vmem:[#allocation2 + $0x70] sm:$0xff] %v219_v31  ;;  %v190_v38 = vadd.f32 %v301_v36, %v257_v11  ;;  %v222_v39 = vadd.f32 %v309_v37, %v257_v11  ;;  %v181_v40 = vpop.f32.mrb[7].mxu0  ;;  %v213_v41 = vpop.f32.mrb[7].mxu1 }
  0xed   :  { %229 = vst [vmem:[#allocation2 + $0x20] sm:$0xff] %v179_v34  ;;  %237 = vst [vmem:[#allocation2 + $0x60] sm:$0xff] %v211_v35  ;;  %v182_v42 = vadd.f32 %v257_v11, %v181_v40  ;;  %v214_v43 = vadd.f32 %v257_v11, %v213_v41 }
  0xee   :  { %232 = vst [vmem:[#allocation2 + $0x38] sm:$0xff] %v190_v38  ;;  %240 = vst [vmem:[#allocation2 + $0x78] sm:$0xff] %v222_v39 }
  0xef   :  { %230 = vst [vmem:[#allocation2 + $0x28] sm:$0xff] %v182_v42  ;;  %238 = vst [vmem:[#allocation2 + $0x68] sm:$0xff] %v214_v43 }
  0xf0   :  { %341 = shalt.err (!%p338_p4)
}
  0xf1   :  { %s342_s11 = scalar_lea.hbm %s436_s3, 2048 }
  0xf2   :  { %p343_p5 = scmp.ne.s32.totalorder %s436_s3, %s342_s11  ;;  %p346_p6 = scmp.lt.u32.totalorder %s342_s11, %s436_s3 }
  0xf4   :  { %p348_p7 = pnand %p346_p6, %p343_p5 }
  0xf6   :  { %351 = shalt.err (!%p348_p7)
}
  0xf7   :  { %s355_s16 = smov 128   ;;  %s356_s17 = smov 8  }
  0xf8   :  { %252 = dma.vmem_to_hbm [thread:$0]  %s247_s2, 2048, %s436_s3, [#allocation3], %s355_s16, %s355_s16, %s356_s17  }
  0xf9   :  { %352 = dma.done.wait [#allocation3], 2048  }
  0xfa   :  { %353 = vsyncadd [#allocation3], 4294965248 }
  0xfb   :  { %256 = vsyncpa [#allocation3], 1 }

</bundles_post_ra>
